<compile_context>
chip_gen: v5e
topology: v5e:2x2
jax: 0.10.0
libtpu: 0.0.40
codegen_flags: <defaults>
</compile_context>

<pallas_src>
import functools

import jax
import jax.numpy as jnp
from jax import lax
from jax.experimental import pallas as pl
from jax.experimental.pallas import tpu as pltpu


def _apply_tail_mask(xp, k, thw, hw):
    """Zero lanes past the true H*W extent (partial last reduction block)."""
    lane = lax.broadcasted_iota(jnp.int32, xp.shape, dimension=1) + k * thw
    return jnp.where(lane < hw, xp, jnp.float32(0.0))


def _int_pow(x, p):
    """x**p for a static positive integer p, as plain VPU multiplies."""
    assert p >= 1
    result = None
    base = x
    while p:
        if p & 1:
            result = base if result is None else result * base
        p >>= 1
        if p:
            base = base * base
    return result


def _gem_kernel_dynamic(pk_ref, x_ref, o_ref, acc_ref, *, minval, hw, thw, inv_hw):
    """Learnable-p path: x**p via exp(p*log(x)) (EUP).  Requires minval > 0.

    pk_ref : SMEM (1,) f32     -- learnable exponent p
    x_ref  : VMEM (TR, THW)    -- input tile, H*W on the lane axis
    o_ref  : VMEM (TR, 1)      -- pooled output tile
    acc_ref: VMEM (TR, 1) f32  -- running spatial sum of x**p
    """
    k = pl.program_id(1)  # innermost reduction axis over H*W tiles

    @pl.when(k == 0)
    def _init():
        acc_ref[...] = jnp.zeros_like(acc_ref)

    pk = pk_ref[0]
    x = jnp.maximum(x_ref[...].astype(jnp.float32), jnp.float32(minval))  # clamp (VPU)
    xp = jnp.exp(pk * jnp.log(x))                                         # x ** p (EUP)
    if hw % thw != 0:
        xp = _apply_tail_mask(xp, k, thw, hw)
    acc_ref[...] += jnp.sum(xp, axis=1, keepdims=True)                    # lane reduce (XLU)

    @pl.when(k == pl.num_programs(1) - 1)
    def _finalize():
        mean = acc_ref[...] * jnp.float32(inv_hw)
        o_ref[...] = jnp.exp(jnp.log(mean) / pk).astype(o_ref.dtype)      # mean ** (1/p)


def _gem_kernel_static_int(x_ref, o_ref, acc_ref, *, minval, p, hw, thw, inv_hw):
    """Static integer-p fast path: x**p as VPU multiplies (no per-element EUP)."""
    k = pl.program_id(1)

    @pl.when(k == 0)
    def _init():
        acc_ref[...] = jnp.zeros_like(acc_ref)

    x = jnp.maximum(x_ref[...].astype(jnp.float32), jnp.float32(minval))
    xp = _int_pow(x, p)
    if hw % thw != 0:
        xp = _apply_tail_mask(xp, k, thw, hw)
    acc_ref[...] += jnp.sum(xp, axis=1, keepdims=True)

    @pl.when(k == pl.num_programs(1) - 1)
    def _finalize():
        mean = acc_ref[...] * jnp.float32(inv_hw)
        # Only TR transcendental pairs per output block -- negligible.
        o_ref[...] = jnp.exp(jnp.log(mean) * jnp.float32(1.0 / p)).astype(o_ref.dtype)


# ~4 MiB per input block (x2 double-buffered = 8 MiB): amortizes per-step
# overhead on v7x, fits v5e's 16 MiB scoped-VMEM default with headroom.
_TARGET_BLOCK_BYTES = 4 * 1024 * 1024
_MAX_LANE_TILE = 4096  # lanes per block (multiple of 128)


def _round_up(a, b):
    return -(-a // b) * b


def _pick_tiles(rows, hw):
    """(tr, thw) block shape for the (rows, hw) = (N*C, H*W) slab."""
    # Lane (H*W) tile: a multiple of 128, or the full extent when smaller.
    thw = min(_round_up(hw, 128), _MAX_LANE_TILE)
    if thw > hw:
        thw = hw  # full-dim block is always legal and avoids masking
    # Row (N*C) tile: multiple of 8 (or full dim), sized to ~_TARGET_BLOCK_BYTES.
    target_elems = _TARGET_BLOCK_BYTES // 4
    tr_cap = max(8, (target_elems // thw) // 8 * 8)
    tr = rows if rows <= tr_cap else tr_cap
    # Megacore (v7x, 2 TCs): ensure >= 2 blocks on the "parallel" row axis.
    if -(-rows // tr) == 1 and rows > 8:
        tr = _round_up(-(-rows // 2), 8)
    return tr, thw


@functools.partial(jax.jit, static_argnums=(2, 3))
def gem_forward(x, pk, minval, p_int=None):
    """GeM pooling. x: (N, C, H, W), pk: (1,) learnable exponent -> (N, C, 1, 1).

    minval must be > 0 (the module uses a small positive epsilon).
    If p_int is a static positive integer equal to pk, the VPU integer-pow
    fast path is used (no per-element exp/log).
    """
    N, C, H, W = x.shape
    R, HW = N * C, H * W
    x2d = x.reshape(R, HW)  # free: NCHW is row-major contiguous, no HBM traffic

    tr, thw = _pick_tiles(R, HW)
    grid = (-(-R // tr), -(-HW // thw))  # reduction (H*W) axis last

    common = dict(minval=float(minval), hw=HW, thw=thw, inv_hw=1.0 / HW)
    x_spec = pl.BlockSpec((tr, thw), lambda r, k: (r, k))
    out_spec = pl.BlockSpec((tr, 1), lambda r, k: (r, 0))

    if p_int is not None:
        kernel = functools.partial(_gem_kernel_static_int, p=int(p_int), **common)
        in_specs = [x_spec]
        operands = (x2d,)
        flops = (int(p_int) + 1) * R * HW
        transcendentals = 2 * R
    else:
        kernel = functools.partial(_gem_kernel_dynamic, **common)
        in_specs = [pl.BlockSpec(memory_space=pltpu.SMEM), x_spec]
        operands = (jnp.asarray(pk, jnp.float32).reshape(1), x2d)
        flops = 3 * R * HW
        transcendentals = 2 * R * HW + 2 * R

    out2d = pl.pallas_call(
        kernel,
        out_shape=jax.ShapeDtypeStruct((R, 1), x.dtype),
        grid_spec=pltpu.PrefetchScalarGridSpec(
            num_scalar_prefetch=0,
            grid=grid,
            in_specs=in_specs,
            out_specs=out_spec,
            scratch_shapes=[pltpu.VMEM((tr, 1), jnp.float32)],
        ),
        compiler_params=pltpu.CompilerParams(
            dimension_semantics=("parallel", "arbitrary"),
        ),
        cost_estimate=pl.CostEstimate(
            flops=flops,
            transcendentals=transcendentals,
            bytes_accessed=x.size * x.dtype.itemsize + R * x.dtype.itemsize,
        ),
    )(*operands)

    return out2d.reshape(N, C, 1, 1)


if __name__ == "__main__":
    # Deterministic parameter init (mirrors args.pk / args.minval).
    PK = 3.0
    MINVAL = 1e-6

    key = jax.random.PRNGKey(0)
    x = jax.random.uniform(key, (2, 4, 16, 16), dtype=jnp.float32)  # (N, C, H, W)
    pk = jnp.full((1,), PK, dtype=jnp.float32)                      # learnable p

    out_dyn = gem_forward(x, pk, MINVAL, None)  # general learnable-p path
    out_int = gem_forward(x, pk, MINVAL, 3)     # static integer-p VPU fast path
    jax.block_until_ready((out_dyn, out_int))

    # Reference (avg_pool2d over the full window == spatial mean).
    ref = jnp.mean(jnp.maximum(x, MINVAL) ** PK, axis=(-2, -1), keepdims=True) ** (1.0 / PK)

    assert out_dyn.shape == (2, 4, 1, 1), out_dyn.shape
    assert jnp.allclose(out_dyn, ref, rtol=1e-5, atol=1e-6), "dynamic-p mismatch vs reference"
    assert jnp.allclose(out_int, ref, rtol=1e-5, atol=1e-6), "static-p mismatch vs reference"

    print("KERNEL_OK")
</pallas_src>

<mosaic_0001>
module attributes {stable_mosaic.version = 11 : i64} {
  func.func @_gem_kernel_dynamic(%arg0: i32, %arg1: i32, %arg2: memref<1xf32, #tpu.memory_space<smem>>, %arg3: memref<8x256xf32, #tpu.memory_space<vmem>>, %arg4: memref<8x1xf32, #tpu.memory_space<vmem>>, %arg5: memref<8x1xf32, #tpu.memory_space<vmem>>) attributes {dimension_semantics = [#tpu.dimension_semantics<parallel>, #tpu.dimension_semantics<arbitrary>], iteration_bounds = array<i64: 1, 1>, scalar_prefetch = 0 : i64, scratch_operands = 1 : i64, tpu.core_type = #tpu.core_type<tc>, window_params = [{transform_indices = @transform_0, window_bounds = array<i64: 1>}, {transform_indices = @transform_1, window_bounds = array<i64: 8, 256>}, {transform_indices = @transform_2, window_bounds = array<i64: 8, 1>}]} {
    %c0_i32 = arith.constant 0 : i32
    %0 = arith.cmpi eq, %arg1, %c0_i32 : i32
    %1 = arith.extui %0 : i1 to i32
    %c0_i32_0 = arith.constant 0 : i32
    %2 = arith.cmpi ne, %1, %c0_i32_0 : i32
    scf.if %2 {
      %cst_10 = arith.constant 0.000000e+00 : f32
      %19 = vector.broadcast %cst_10 : f32 to vector<8x1xf32>
      %c0_11 = arith.constant 0 : index
      %c0_12 = arith.constant 0 : index
      %20 = vector.load %arg5[%c0_11, %c0_12] : memref<8x1xf32, #tpu.memory_space<vmem>>, vector<8x1xf32>
      tpu.vector_store %arg5[%c0_11, %c0_12], %19 {strides = array<i32>} : memref<8x1xf32, #tpu.memory_space<vmem>>, vector<8x1xf32>,
    } else {
    }
    %c0 = arith.constant 0 : index
    %3 = memref.load %arg2[%c0] : memref<1xf32, #tpu.memory_space<smem>>
    %c0_1 = arith.constant 0 : index
    %c0_2 = arith.constant 0 : index
    %4 = vector.load %arg3[%c0_1, %c0_2] : memref<8x256xf32, #tpu.memory_space<vmem>>, vector<8x256xf32>
    %cst = arith.constant 9.99999997E-7 : f32
    %5 = vector.broadcast %cst : f32 to vector<8x256xf32>
    %6 = arith.maximumf %4, %5 : vector<8x256xf32>
    %7 = math.log %6 : vector<8x256xf32>
    %8 = vector.broadcast %3 : f32 to vector<8x256xf32>
    %9 = arith.mulf %8, %7 : vector<8x256xf32>
    %10 = math.exp %9 : vector<8x256xf32>
    %c0_3 = arith.constant 0 : index
    %c0_4 = arith.constant 0 : index
    %11 = vector.load %arg5[%c0_3, %c0_4] : memref<8x1xf32, #tpu.memory_space<vmem>>, vector<8x1xf32>
    %cst_5 = arith.constant dense<0.000000e+00> : vector<8xf32>
    %12 = vector.multi_reduction <add>, %10, %cst_5 [1] : vector<8x256xf32> to vector<8xf32>
    %13 = vector.shape_cast %12 : vector<8xf32> to vector<8x1xf32>
    %14 = arith.addf %11, %13 : vector<8x1xf32>
    %c0_6 = arith.constant 0 : index
    %c0_7 = arith.constant 0 : index
    %15 = vector.load %arg5[%c0_6, %c0_7] : memref<8x1xf32, #tpu.memory_space<vmem>>, vector<8x1xf32>
    tpu.vector_store %arg5[%c0_6, %c0_7], %14 {strides = array<i32>} : memref<8x1xf32, #tpu.memory_space<vmem>>, vector<8x1xf32>,
    %c0_i32_8 = arith.constant 0 : i32
    %16 = arith.cmpi eq, %arg1, %c0_i32_8 : i32
    %17 = arith.extui %16 : i1 to i32
    %c0_i32_9 = arith.constant 0 : i32
    %18 = arith.cmpi ne, %17, %c0_i32_9 : i32
    scf.if %18 {
      %c0_10 = arith.constant 0 : index
      %c0_11 = arith.constant 0 : index
      %19 = vector.load %arg5[%c0_10, %c0_11] : memref<8x1xf32, #tpu.memory_space<vmem>>, vector<8x1xf32>
      %cst_12 = arith.constant 3.906250e-03 : f32
      %20 = vector.broadcast %cst_12 : f32 to vector<8x1xf32>
      %21 = arith.mulf %19, %20 : vector<8x1xf32>
      %22 = math.log %21 : vector<8x1xf32>
      %23 = vector.broadcast %3 : f32 to vector<8x1xf32>
      %24 = arith.divf %22, %23 : vector<8x1xf32>
      %25 = math.exp %24 : vector<8x1xf32>
      %c0_13 = arith.constant 0 : index
      %c0_14 = arith.constant 0 : index
      %26 = vector.load %arg4[%c0_13, %c0_14] : memref<8x1xf32, #tpu.memory_space<vmem>>, vector<8x1xf32>
      tpu.vector_store %arg4[%c0_13, %c0_14], %25 {strides = array<i32>} : memref<8x1xf32, #tpu.memory_space<vmem>>, vector<8x1xf32>,
    } else {
    }
    return
  }
  func.func @transform_0(%arg0: i32, %arg1: i32) -> i32 {
    %c0_i32 = arith.constant 0 : i32
    %c0_i32_0 = arith.constant 0 : i32
    return %c0_i32 : i32
  }
  func.func @transform_1(%arg0: i32, %arg1: i32) -> (i32, i32) {
    %c0_i32 = arith.constant 0 : i32
    return %arg0, %arg1 : i32, i32
  }
  func.func @transform_2(%arg0: i32, %arg1: i32) -> (i32, i32) {
    %c0_i32 = arith.constant 0 : i32
    %c0_i32_0 = arith.constant 0 : i32
    return %arg0, %c0_i32 : i32, i32
  }
}

</mosaic_0001>

<bundles_post_ra>
// kernel: gem_forward.1
= control target key start
LH: loop header
LB: loop body
LE: loop exit
PB: predicated region body
PF: predicated region fallthrough
CT: control target
= control target key end

     0   :  { %vm16_vm0 = vcmask 7168   ;;  %v85_v2 = vmov 0.0   ;;  %s116_s1 = inlined_call_operand.vmem [shape: f32[8,256], index: 1, kind: input, shape index: {}]   ;;  %s117_s0 = inlined_call_operand.<no memory space> [shape: f32[1], index: 0, kind: input, shape index: {}]   ;;  %s118_s2 = inlined_call_operand.vmem [shape: f32[8,1], index: 2, kind: output, shape index: {}]  }
   0x1   :  { %v19_v0 = vld [vmem:[%s116_s1] sm:$0xff]  ;;  %v20_v1 = vld [vmem:[%s116_s1 + $0x8] sm:$0xff]  ;;  %17 = vst.msk [vmem:[#allocation2] sm:$0xff] %vm16_vm0, %v85_v2  ;;  %v27_v6 = vstv %s117_s0 }
   0x2   :  { %v21_v3 = vmax.f32 %v19_v0, 1e-06  ;;  %v22_v4 = vmax.f32 %v20_v1, 1e-06  ;;  %vm53_vm1 = vweird.f32 %v27_v6  ;;  %v59_v25 = vand.u32 2147483648, %v27_v6 }
   0x3   :  { %v57_v28 = vand.u32 2147483647, %v27_v6 }
   0x4   :  { %71 = vlog2.f32 %v21_v3  ;;  %v60_v29 = vor.u32 1.1754944e-38, %v59_v25 }
   0x5   :  { %73 = vlog2.f32 %v22_v4  ;;  %vm58_vm4 = vcmp.eq.f32.partialorder %v57_v28, 8.507059e+37 }
   0x8   :  { %v34_v18 = vld [vmem:[#allocation2] sm:$0xff] }
   0xa   :  { %v72_v5 = vpop.eup %71 }
   0xb   :  { %v74_v7 = vpop.eup %73  ;;  %v24_v8 = vmul.f32 0.6931472, %v72_v5 }
   0xc   :  { %v26_v9 = vmul.f32 0.6931472, %v74_v7 }
   0xd   :  { %v28_v10 = vmul.f32 %v27_v6, %v24_v8 }
   0xe   :  { %v29_v11 = vmul.f32 %v27_v6, %v26_v9 }
   0xf   :  { %v30_v12 = vmul.f32 1.442695, %v28_v10 }
  0x10   :  { %v32_v13 = vmul.f32 1.442695, %v29_v11 }
  0x11   :  { %75 = vpow2.f32 %v30_v12 }
  0x12   :  { %77 = vpow2.f32 %v32_v13 }
  0x13   :  { %79 = vrcp.f32 %v27_v6 }
  0x17   :  { %v76_v14 = vpop.eup %75 }
  0x18   :  { %v78_v15 = vpop.eup %77 }
  0x19   :  { %v35_v16 = vadd.f32 %v78_v15, %v76_v14  ;;  %v80_v17 = vpop.eup %79 }
  0x1a   :  { %v49_v19 = vmul.f32 %v80_v17, %v27_v6  ;;  %vm54_vm2 = vweird.f32 %v80_v17 }
  0x1b   :  { %36 = vadd.xlane.f32.xlu0 %v35_v16  ;;  %vm55_vm3 = vmor %vm53_vm1, %vm54_vm2 }
  0x1c   :  { %v50_v22 = vsub.f32 1.0, %v49_v19 }
  0x1e   :  { %v51_v23 = vmul.f32 %v80_v17, %v50_v22 }
  0x20   :  { %v52_v27 = vadd.f32 %v80_v17, %v51_v23 }
  0x22   :  { %v56_v30 = vsel %vm55_vm3, %v80_v17, %v52_v27 }
  0x23   :  { %v61_v32 = vsel %vm58_vm4, %v60_v29, %v56_v30 }
  0x8e   :  { %v37_v20 = vpop.xlane.xlu0 %36 }
  0x8f   :  { %v38_v21 = vadd.f32 %v37_v20, %v34_v18 }
  0x91   :  { %40 = vst.msk [vmem:[#allocation2] sm:$0xff] %vm16_vm0, %v38_v21 }
  0x98   :  { %v44_v24 = vld [vmem:[#allocation2] sm:$0xff] }
  0x99   :  { %v45_v26 = vmul.f32 0.00390625, %v44_v24 }
  0x9b   :  { %81 = vlog2.f32 %v45_v26 }
  0xa1   :  { %v82_v31 = vpop.eup %81 }
  0xa2   :  { %v47_v33 = vmul.f32 0.6931472, %v82_v31 }
  0xa4   :  { %v62_v34 = vmul.f32 %v61_v32, %v47_v33 }
  0xa6   :  { %v63_v35 = vmul.f32 1.442695, %v62_v34 }
  0xa8   :  { %83 = vpow2.f32 %v63_v35 }
  0xae   :  { %v84_v36 = vpop.eup %83 }
  0xaf   :  { %65 = vst.msk [vmem:[%s118_s2] sm:$0xff] %vm16_vm0, %v84_v36 }

</bundles_post_ra>
